<compile_context>
chip_gen: v7x
topology: tpu7x:2x2x1
jax: 0.10.0
libtpu: 0.0.40
codegen_flags: <defaults>
</compile_context>

<pallas_src>
import jax
import jax.numpy as jnp
from jax.experimental import pallas as pl
from jax.experimental.pallas import tpu as pltpu


# ----------------------------- Pallas kernel ------------------------------ #
def _linear_readout_kernel(x_ref, w_ref, o_ref):
    # x_ref: (TILE_N, D_in)  w_ref: (D_in, D_out) [f32]  o_ref: (TILE_N, D_out)
    # Upcast the streamed tile to f32 on the VPU (free relative to the DMA);
    # accumulate in f32 on the MXU.
    x = x_ref[...].astype(jnp.float32)
    o_ref[...] = jnp.dot(
        x, w_ref[...], preferred_element_type=jnp.float32
    ).astype(o_ref.dtype)


def _round_up(v: int, m: int) -> int:
    return ((v + m - 1) // m) * m


def linear_dipole_polar_readout(
    x: jax.Array,
    w_dense: jax.Array,
    *,
    tile_n: int = 4096,
) -> jax.Array:
    """y = x @ W_dense, tiled over rows.  Output is float32, shape (n, 10).

    x may be f32 or bf16 — it is streamed as-is (no wrapper-side cast; casting
    here would add a full extra HBM pass).  W is kept in float32.
    """
    n, d_in = x.shape
    d_in_w, d_out = w_dense.shape
    assert d_in == d_in_w
    w_dense = w_dense.astype(jnp.float32)  # resident in VMEM; keep full precision

    # Row tile: multiple of 16 (satisfies both f32's 8-row and bf16's 16-row
    # sublane minimum), clamped to the row-rounded problem size so small
    # inputs use one small block instead of a huge padded one.
    tile_n = max(16, (tile_n // 16) * 16)
    tile_n = min(tile_n, _round_up(max(n, 1), 16))

    grid = (pl.cdiv(n, tile_n),)
    y = pl.pallas_call(
        _linear_readout_kernel,
        out_shape=jax.ShapeDtypeStruct((n, d_out), jnp.float32),
        grid_spec=pl.GridSpec(
            grid=grid,
            in_specs=[
                # x streamed tile-by-tile: this IS the entire HBM roofline.
                # Ragged last block is masked by Pallas; no wrapper-side pad.
                pl.BlockSpec((tile_n, d_in), lambda i: (i, 0)),
                # W: constant block index -> stays resident in VMEM, no re-DMA.
                pl.BlockSpec((d_in, d_out), lambda i: (0, 0)),
            ],
            out_specs=pl.BlockSpec((tile_n, d_out), lambda i: (i, 0)),
        ),
        compiler_params=pltpu.CompilerParams(
            # Rows shard across the 2 TensorCores on v7x.
            dimension_semantics=("parallel",),
            # Real footprint @ 4096 rows ~16.3 MiB (lane padding 288->384 on x,
            # 10->128 on out, double-buffered) -> exceeds v5e's 16 MiB scoped
            # default; request 48 MiB (safe on all of v5e/v6e/v7x).
            vmem_limit_bytes=48 << 20,
        ),
    )(x, w_dense)
    return y


# ------------------------------ Param setup -------------------------------- #
def build_dense_weight(w0e, w1o, w2e, mul_in: int) -> jax.Array:
    """Fold the per-irrep e3nn Linear weights into one dense matrix.

    Input irreps:  f"{mul_in}x0e + {mul_in}x1o + {mul_in}x2e"
    Output irreps: "2x0e + 1x1o + 1x2e"  (dim 10)
      w0e: (mul_in, 2)   w1o: (mul_in, 1)   w2e: (mul_in, 1)
    Path normalization (e3nn default 'element'): weight / sqrt(mul_in).
    """
    d_in = mul_in * (1 + 3 + 5)
    d_out = 2 + 3 + 5
    norm = 1.0 / jnp.sqrt(jnp.asarray(mul_in, jnp.float32))

    W = jnp.zeros((d_in, d_out), jnp.float32)
    # 0e block: plain channel mixing
    W = W.at[0:mul_in, 0:2].set(w0e * norm)
    # 1o block: mix channels, identity over the 3 m-components (channel-major)
    blk1 = jnp.kron(w1o, jnp.eye(3, dtype=jnp.float32)) * norm  # (mul_in*3, 3)
    W = W.at[mul_in:mul_in + 3 * mul_in, 2:5].set(blk1)
    # 2e block: identity over the 5 m-components
    blk2 = jnp.kron(w2e, jnp.eye(5, dtype=jnp.float32)) * norm  # (mul_in*5, 5)
    W = W.at[mul_in + 3 * mul_in:, 5:10].set(blk2)
    return W


# --------------------------------- Main ------------------------------------ #
if __name__ == "__main__":
    key = jax.random.PRNGKey(0)
    k_x, k_w0, k_w1, k_w2, k_x2 = jax.random.split(key, 5)

    mul_in = 32                               # irreps_in = "32x0e + 32x1o + 32x2e"
    d_in = mul_in * (1 + 3 + 5)               # 288

    # Deterministic "weights" (e3nn initializes with standard normal).
    w0e = jax.random.normal(k_w0, (mul_in, 2), dtype=jnp.float32)
    w1o = jax.random.normal(k_w1, (mul_in, 1), dtype=jnp.float32)
    w2e = jax.random.normal(k_w2, (mul_in, 1), dtype=jnp.float32)
    w_dense = build_dense_weight(w0e, w1o, w2e, mul_in)

    # --- Case 1: small demo, single (ragged) block, f32 ---
    n_nodes = 8
    x = jax.random.normal(k_x, (n_nodes, d_in), dtype=jnp.float32)
    y = jax.block_until_ready(linear_dipole_polar_readout(x, w_dense))
    y_ref = x @ w_dense
    assert y.shape == (n_nodes, 10)
    assert jnp.allclose(y, y_ref, atol=1e-5, rtol=1e-5)

    # --- Case 2: non-divisible n with an explicit small tile ->
    #             multi-step grid with a ragged last block (no padding pass) ---
    n2 = 100
    x2 = jax.random.normal(k_x2, (n2, d_in), dtype=jnp.float32)
    y2 = jax.block_until_ready(
        linear_dipole_polar_readout(x2, w_dense, tile_n=32))
    y2_ref = x2 @ w_dense
    assert y2.shape == (n2, 10)
    assert jnp.allclose(y2, y2_ref, atol=1e-5, rtol=1e-5)

    # --- Case 3: caller already holds bf16 activations -> stream them as-is
    #             (no wrapper cast), W stays f32, f32 accumulation/output ---
    x2_bf16 = x2.astype(jnp.bfloat16)
    y3 = jax.block_until_ready(
        linear_dipole_polar_readout(x2_bf16, w_dense, tile_n=32))
    y3_ref = x2_bf16.astype(jnp.float32) @ w_dense
    assert y3.shape == (n2, 10)
    assert jnp.allclose(y3, y3_ref, atol=1e-4, rtol=1e-4)

    print("KERNEL_OK")
</pallas_src>

<mosaic_0001>
module attributes {stable_mosaic.version = 11 : i64} {
  func.func @_linear_readout_kernel(%arg0: i32, %arg1: memref<16x288xf32, #tpu.memory_space<vmem>>, %arg2: memref<288x10xf32, #tpu.memory_space<vmem>>, %arg3: memref<16x10xf32, #tpu.memory_space<vmem>>) attributes {dimension_semantics = [#tpu.dimension_semantics<parallel>], iteration_bounds = array<i64: 1>, scalar_prefetch = 0 : i64, scratch_operands = 0 : i64, tpu.core_type = #tpu.core_type<tc>, window_params = [{transform_indices = @transform_0, window_bounds = array<i64: 16, 288>}, {pipeline_mode = #tpu.pipeline_mode<synchronous>, transform_indices = @transform_1, window_bounds = array<i64: 288, 10>}, {transform_indices = @transform_2, window_bounds = array<i64: 16, 10>}]} {
    %c0 = arith.constant 0 : index
    %c0_0 = arith.constant 0 : index
    %0 = vector.load %arg1[%c0, %c0_0] : memref<16x288xf32, #tpu.memory_space<vmem>>, vector<16x288xf32>
    %c0_1 = arith.constant 0 : index
    %c0_2 = arith.constant 0 : index
    %1 = vector.load %arg2[%c0_1, %c0_2] : memref<288x10xf32, #tpu.memory_space<vmem>>, vector<288x10xf32>
    %cst = arith.constant dense<0.000000e+00> : vector<16x10xf32>
    %2 = tpu.matmul %0, %1, %cst {dimension_numbers = #tpu.dot_dimension_numbers<[1], [0], [0], [1], [0, 0, 1, 1], [], []>} : vector<16x288xf32>, vector<288x10xf32>, vector<16x10xf32> -> vector<16x10xf32>
    %c0_3 = arith.constant 0 : index
    %c0_4 = arith.constant 0 : index
    %3 = vector.load %arg3[%c0_3, %c0_4] : memref<16x10xf32, #tpu.memory_space<vmem>>, vector<16x10xf32>
    tpu.vector_store %arg3[%c0_3, %c0_4], %2 {strides = array<i32>} : memref<16x10xf32, #tpu.memory_space<vmem>>, vector<16x10xf32>,
    return
  }
  func.func @transform_0(%arg0: i32) -> (i32, i32) {
    %c0_i32 = arith.constant 0 : i32
    %c0_i32_0 = arith.constant 0 : i32
    return %arg0, %c0_i32 : i32, i32
  }
  func.func @transform_1(%arg0: i32) -> (i32, i32) {
    %c0_i32 = arith.constant 0 : i32
    %c0_i32_0 = arith.constant 0 : i32
    %c0_i32_1 = arith.constant 0 : i32
    return %c0_i32, %c0_i32_0 : i32, i32
  }
  func.func @transform_2(%arg0: i32) -> (i32, i32) {
    %c0_i32 = arith.constant 0 : i32
    %c0_i32_0 = arith.constant 0 : i32
    return %arg0, %c0_i32 : i32, i32
  }
}

</mosaic_0001>

<bundles_post_ra>
// kernel: tpu_custom_call.1
= control target key start
LH: loop header
LB: loop body
LE: loop exit
PB: predicated region body
PF: predicated region fallthrough
CT: control target
= control target key end

     0   :  { %7 = vsyncpa [#allocation3], 0  ;;  %vm54_vm0 = vcmask 261120   ;;  %vm211_vm1 = vcmask 80896   ;;  %s512_s0 = inlined_call_operand.vmem [shape: f32[8,288], index: 0, kind: input, shape index: {}]   ;;  %s513_s1 = inlined_call_operand.vmem [shape: f32[288,10], index: 1, kind: input, shape index: {}]   ;;  %s514_s2 = inlined_call_operand.hbm [shape: f32[8,10], index: 2, kind: output, shape index: {}]  }
   0x1   :  { %v34_v0 = vld [vmem:[%s513_s1 + $0x80] sm:$0xff]  ;;  %v35_v1 = vld [vmem:[%s513_s1 + $0x88] sm:$0xff]  ;;  %v36_v5 = vld [vmem:[%s513_s1 + $0x90] sm:$0xff] }
   0x2   :  { %v287_v2 = vpack.c.bf16 %v35_v1, %v34_v0  ;;  %v18_v3 = vld [vmem:[%s513_s1] sm:$0xff]  ;;  %v19_v4 = vld [vmem:[%s513_s1 + $0x8] sm:$0xff]  ;;  %v37_v7 = vld [vmem:[%s513_s1 + $0x98] sm:$0xff] }
   0x3   :  { %v289_v6 = vpack.c.bf16 %v19_v4, %v18_v3  ;;  %v20_v8 = vld [vmem:[%s513_s1 + $0x10] sm:$0xff]  ;;  %v21_v9 = vld [vmem:[%s513_s1 + $0x18] sm:$0xff]  ;;  %v291_v10 = vpack.c.bf16 %v37_v7, %v36_v5  ;;  %v38_v11 = vld [vmem:[%s513_s1 + $0xa0] sm:$0xff] }
   0x4   :  { %288 = vmatprep.subr.bf16.mxu0 %v287_v2  ;;  %v39_v12 = vld [vmem:[%s513_s1 + $0xa8] sm:$0xff]  ;;  %v293_v13 = vpack.c.bf16 %v21_v9, %v20_v8  ;;  %v22_v15 = vld [vmem:[%s513_s1 + $0x20] sm:$0xff]  ;;  %v40_v17 = vld [vmem:[%s513_s1 + $0xb0] sm:$0xff] }
   0x5   :  { %290 = vmatpush3.bf16.msra.mxu0 %v289_v6  ;;  %v295_v14 = vpack.c.bf16 %v39_v12, %v38_v11  ;;  %v23_v16 = vld [vmem:[%s513_s1 + $0x28] sm:$0xff]  ;;  %v41_v18 = vld [vmem:[%s513_s1 + $0xb8] sm:$0xff]  ;;  %v24_v21 = vld [vmem:[%s513_s1 + $0x30] sm:$0xff] }
   0x6   :  { %292 = vmatprep.subr.bf16.mxu0 %v291_v10  ;;  %v297_v19 = vpack.c.bf16 %v23_v16, %v22_v15  ;;  %v299_v20 = vpack.c.bf16 %v41_v18, %v40_v17  ;;  %v25_v22 = vld [vmem:[%s513_s1 + $0x38] sm:$0xff]  ;;  %v50_v23 = vld [vmem:[%s513_s1 + $0x100] sm:$0xff]  ;;  %v43_v25 = vld [vmem:[%s513_s1 + $0xc8] sm:$0xff] }
   0x7   :  { %v42_v24 = vld [vmem:[%s513_s1 + $0xc0] sm:$0xff]  ;;  %v51_v26 = vld [vmem:[%s513_s1 + $0x108] sm:$0xff]  ;;  %v52_v28 = vld [vmem:[%s513_s1 + $0x110] sm:$0xff]  ;;  %v301_v29 = vpack.c.bf16 %v25_v22, %v24_v21 }
   0x8   :  { %v319_v27 = vpack.c.bf16 %v51_v26, %v50_v23  ;;  %v53_v30 = vld [vmem:[%s513_s1 + $0x118] sm:$0xff]  ;;  %v13_v31 = vld [vmem:[%s512_s0 + $0x8] sm:$0xff]  ;;  %v303_v32 = vpack.c.bf16 %v43_v25, %v42_v24  ;;  %v26_v33 = vld [vmem:[%s513_s1 + $0x40] sm:$0xff] }
   0x9   :  { %294 = vmatpush3.bf16.msra.mxu0 %v293_v13  ;;  %v27_v34 = vld [vmem:[%s513_s1 + $0x48] sm:$0xff]  ;;  %v323_v35 = vpack.c.bf16 %v53_v30, %v52_v28  ;;  %v14_v36 = vld [vmem:[%s512_s0 + $0x10] sm:$0xff]  ;;  %v45_v38 = vld [vmem:[%s513_s1 + $0xd8] sm:$0xff]  ;;  %125 = vmatprep.mubr.f32.mxu0 %v13_v31 }
   0xa   :  { %296 = vmatprep.subr.bf16.mxu0 %v295_v14  ;;  %320 = vmatprep.subr.bf16.mxu1 %v319_v27  ;;  %v44_v37 = vld [vmem:[%s513_s1 + $0xd0] sm:$0xff]  ;;  %v305_v39 = vpack.c.bf16 %v27_v34, %v26_v33  ;;  %v29_v42 = vld [vmem:[%s513_s1 + $0x58] sm:$0xff]  ;;  %v46_v43 = vld [vmem:[%s513_s1 + $0xe0] sm:$0xff] }
   0xb   :  { %322 = vmatpush3.bf16.msra.mxu1 %v319_v27  ;;  %284 = vmatprep.mubr.msk.f32.mxu1 %vm54_vm0, %v14_v36  ;;  %v307_v40 = vpack.c.bf16 %v45_v38, %v44_v37  ;;  %v28_v41 = vld [vmem:[%s513_s1 + $0x50] sm:$0xff]  ;;  %v47_v44 = vld [vmem:[%s513_s1 + $0xe8] sm:$0xff]  ;;  %v30_v48 = vld [vmem:[%s513_s1 + $0x60] sm:$0xff] }
   0xc   :  { %324 = vmatprep.subr.bf16.mxu1 %v323_v35  ;;  %v17_v45 = vld [vmem:[%s512_s0 + $0x28] sm:$0xff]  ;;  %v309_v46 = vpack.c.bf16 %v29_v42, %v28_v41  ;;  %v311_v47 = vpack.c.bf16 %v47_v44, %v46_v43  ;;  %v48_v50 = vld [vmem:[%s513_s1 + $0xf0] sm:$0xff]  ;;  %v49_v51 = vld [vmem:[%s513_s1 + $0xf8] sm:$0xff] }
   0xd   :  { %298 = vmatpush3.bf16.msra.mxu0 %v297_v19  ;;  %v31_v49 = vld [vmem:[%s513_s1 + $0x68] sm:$0xff]  ;;  %v315_v53 = vpack.c.bf16 %v49_v51, %v48_v50  ;;  %v32_v54 = vld [vmem:[%s513_s1 + $0x70] sm:$0xff]  ;;  %v33_v55 = vld [vmem:[%s513_s1 + $0x78] sm:$0xff] }
   0xe   :  { %300 = vmatprep.subr.bf16.mxu0 %v299_v20  ;;  %v313_v52 = vpack.c.bf16 %v31_v49, %v30_v48  ;;  %v317_v56 = vpack.c.bf16 %v33_v55, %v32_v54  ;;  %v12_v57 = vld [vmem:[%s512_s0] sm:$0xff]  ;;  %v15_v59 = vld [vmem:[%s512_s0 + $0x18] sm:$0xff] }
   0xf   :  { %326 = vmatpush3.bf16.msra.mxu1 %v323_v35  ;;  %v16_v58 = vld [vmem:[%s512_s0 + $0x20] sm:$0xff] }
  0x11   :  { %302 = vmatpush3.bf16.msra.mxu0 %v301_v29 }
  0x12   :  { %304 = vmatprep.subr.bf16.mxu0 %v303_v32  ;;  %285 = vmatmul.mubr.msk.f32.vlgmr.msra.gmra.mrb[0].mxu1 %vm54_vm0, %v17_v45 }
  0x15   :  { %306 = vmatpush3.bf16.msra.mxu0 %v305_v39 }
  0x16   :  { %308 = vmatprep.subr.bf16.mxu0 %v307_v40 }
  0x19   :  { %310 = vmatpush3.bf16.msra.mxu0 %v309_v46 }
  0x1a   :  { %312 = vmatprep.subr.bf16.mxu0 %v311_v47 }
  0x1d   :  { %314 = vmatpush3.bf16.msra.mxu0 %v313_v52 }
  0x1e   :  { %316 = vmatprep.subr.bf16.mxu0 %v315_v53 }
  0x21   :  { %318 = vmatpush3.bf16.msra.mxu0 %v317_v56 }
  0x24   :  { %126 = vmatmul.mubr.f32.vlgmr.msra.gmra.mrb[0].mxu0 %v12_v57 }
  0x25   :  { %130 = vmatprep.mubr.f32.mxu0 %v16_v58 }
  0x28   :  { %131 = vmatmul.mubr.f32.gmra.mrb[2].mxu0 %v15_v59 }
  0xe5   :  { %v286_v60 = vpop.f32.mrb[0].mxu1 }
  0xe6   :  { %v202_v61 = vpop.f32.mrb[1].mxu1 }
  0xf7   :  { %v264_v62 = vpop.f32.mrb[0].mxu0 }
  0xf8   :  { %v265_v63 = vpop.f32.mrb[1].mxu0 }
  0xf9   :  { %v266_v0 = vadd.f32 %v265_v63, %v264_v62 }
  0xfb   :  { %v203_v1 = vadd.f32 %v266_v0, %v202_v61  ;;  %v267_v2 = vpop.f32.mrb[2].mxu0 }
  0xfc   :  { %v268_v3 = vpop.f32.mrb[3].mxu0 }
  0xfd   :  { %212 = vst.msk [vmem:[#allocation2] sm:$0xff] %vm211_vm1, %v203_v1  ;;  %v269_v4 = vadd.f32 %v268_v3, %v267_v2 }
  0xff   :  { %v208_v5 = vadd.f32 %v286_v60, %v269_v4 }
 0x101   :  { %213 = vst.msk [vmem:[#allocation2 + $0x8] sm:$0xff] %vm211_vm1, %v208_v5 }
 0x102   :  { %218 = vsyncadd [#allocation3], 128  ;;  %s354_s1 = smov [#allocation2]  }
 0x103   :  { %s219_s9 = sshll.u32 %s354_s1, 4  ;;  %s220_s9 = int_to_ptr.vmem [resolvable:$true] %s219_s9 }
 0x104   :  { %s330_s10 = scalar_lea.vmem %s220_s9, 128  ;;  %s334_s0 = scalar_lea.vmem %s220_s9, 256 }
 0x105   :  { %p331_p0 = scmp.ne.s32.totalorder %s220_s9, %s330_s10  ;;  %p335_p1 = scmp.lt.s32.totalorder %s220_s9, %s220_s9 }
 0x106   :  { %p336_p2 = scmp.lt.s32.totalorder %s334_s0, %s330_s10 }
 0x108   :  { %p337_p3 = por %p336_p2, %p335_p1 }
 0x10a   :  { %p338_p4 = pnand %p337_p3, %p331_p0 }
 0x10c   :  { %341 = shalt.err (!%p338_p4)
}
 0x10d   :  { %s342_s13 = scalar_lea.hbm %s514_s2, 128 }
 0x10e   :  { %p343_p5 = scmp.ne.s32.totalorder %s514_s2, %s342_s13  ;;  %p346_p6 = scmp.lt.u32.totalorder %s342_s13, %s514_s2 }
 0x110   :  { %p348_p7 = pnand %p346_p6, %p343_p5 }
 0x112   :  { %351 = shalt.err (!%p348_p7)
}
 0x113   :  { %s355_s18 = smov 128   ;;  %s356_s19 = smov 8  }
 0x114   :  { %225 = dma.vmem_to_hbm [thread:$0]  %s220_s9, 128, %s514_s2, [#allocation3], %s355_s18, %s355_s18, %s356_s19  }
 0x115   :  { %352 = dma.done.wait [#allocation3], 256  }
 0x116   :  { %353 = vsyncadd [#allocation3], 4294967040 }
 0x117   :  { %229 = vsyncpa [#allocation3], 1 }

</bundles_post_ra>
